<compile_context>
chip_gen: v7x
topology: tpu7x:2x2x1
jax: 0.10.0
libtpu: 0.0.40
codegen_flags: <defaults>
</compile_context>

<pallas_src>
import functools

import jax
import jax.numpy as jnp
from jax import lax
from jax.experimental import pallas as pl
from jax.experimental.pallas import tpu as pltpu

LANE = 128


def _silog_kernel(pred_ref, gt_ref, sum_out, sq_out, acc_sum, acc_sq,
                  *, tm, kb, m_rows, need_mask):
    """Per-slice accumulation of sum(R) and sum(R^2).

    pred_ref, gt_ref : VMEM tiles (tm, 128), input dtype
    sum_out, sq_out  : SMEM (1, 1) f32 per-slice partial outputs
    acc_sum, acc_sq  : VMEM (tm, 128) f32 accumulators (persist across k)
    """
    p = pl.program_id(0)
    k = pl.program_id(1)

    @pl.when(k == 0)
    def _():
        acc_sum[...] = jnp.zeros_like(acc_sum)
        acc_sq[...] = jnp.zeros_like(acc_sq)

    r = pred_ref[...].astype(jnp.float32) - gt_ref[...].astype(jnp.float32)

    if need_mask:
        # Zero out rows past the end of the array (partial / duplicated
        # out-of-range blocks).  Static python flag -> no cost when not needed.
        rows = lax.broadcasted_iota(jnp.int32, r.shape, 0)
        logical_block = p * kb + k
        valid = (logical_block * tm + rows) < m_rows
        r = jnp.where(valid, r, 0.0)

    # Pure VPU adds in the hot loop; no cross-lane reduce, no SMEM round-trip.
    acc_sum[...] += r
    acc_sq[...] += r * r

    @pl.when(k == kb - 1)
    def _():
        sum_out[0, 0] = jnp.sum(acc_sum[...])
        sq_out[0, 0] = jnp.sum(acc_sq[...])


def scale_invariant_log_loss(log_predicted, log_gt, *, tm=1024):
    """Pallas implementation of ScaleInvariantLogLoss.forward (f32 scalar)."""
    assert log_predicted.shape == log_gt.shape
    assert tm % 8 == 0

    n_elems = log_predicted.size
    flat_p = log_predicted.reshape(-1)
    flat_g = log_gt.reshape(-1)

    m_rows = n_elems // LANE          # full lane-dense rows
    n_main = m_rows * LANE
    n_tail = n_elems - n_main         # < 128 ragged tail (static)

    if m_rows == 0:
        # Tiny input: no full 128-lane row; do it all in plain JAX.
        s = jnp.float32(0.0)
        sq = jnp.float32(0.0)
    else:
        p2 = flat_p[:n_main].reshape(m_rows, LANE)
        g2 = flat_g[:n_main].reshape(m_rows, LANE)

        tm_eff = min(tm, m_rows)      # block == full array if m_rows < tm
        nblocks = pl.cdiv(m_rows, tm_eff)
        num_slices = 2 if nblocks >= 2 else 1   # 2 slices -> 2 TCs on v7x
        kb = pl.cdiv(nblocks, num_slices)
        # Mask needed iff the logical grid overshoots the real rows.
        need_mask = (num_slices * kb * tm_eff) != m_rows

        def in_map(p, k, *, kb=kb, nblocks=nblocks):
            # Clamp so duplicated trailing blocks of the last slice stay
            # in-bounds; their contribution is zeroed by the in-kernel mask.
            return (jnp.minimum(p * kb + k, nblocks - 1), 0)

        sum_parts, sq_parts = pl.pallas_call(
            functools.partial(_silog_kernel, tm=tm_eff, kb=kb,
                              m_rows=m_rows, need_mask=need_mask),
            out_shape=(
                jax.ShapeDtypeStruct((num_slices, 1), jnp.float32),
                jax.ShapeDtypeStruct((num_slices, 1), jnp.float32),
            ),
            grid_spec=pltpu.PrefetchScalarGridSpec(
                num_scalar_prefetch=0,
                grid=(num_slices, kb),
                in_specs=[
                    pl.BlockSpec((tm_eff, LANE), in_map),
                    pl.BlockSpec((tm_eff, LANE), in_map),
                ],
                out_specs=[
                    pl.BlockSpec((1, 1), lambda p, k: (p, 0),
                                 memory_space=pltpu.MemorySpace.SMEM),
                    pl.BlockSpec((1, 1), lambda p, k: (p, 0),
                                 memory_space=pltpu.MemorySpace.SMEM),
                ],
                scratch_shapes=[
                    pltpu.VMEM((tm_eff, LANE), jnp.float32),
                    pltpu.VMEM((tm_eff, LANE), jnp.float32),
                ],
            ),
            compiler_params=pltpu.CompilerParams(
                dimension_semantics=("parallel", "arbitrary"),
            ),
        )(p2, g2)

        s = jnp.sum(sum_parts)
        sq = jnp.sum(sq_parts)

    if n_tail > 0:
        # Small (<128 element) ragged tail handled in plain JAX; avoids a
        # full-array jnp.pad HBM pass.
        rt = (flat_p[n_main:].astype(jnp.float32)
              - flat_g[n_main:].astype(jnp.float32))
        s = s + jnp.sum(rt)
        sq = sq + jnp.sum(rt * rt)

    n_f = jnp.float32(n_elems)
    return sq / n_f - (s * s) / (n_f * n_f)


def _reference(log_predicted, log_gt):
    r = (log_predicted - log_gt).astype(jnp.float32)
    term1 = jnp.mean(r * r)
    term2 = jnp.square(jnp.sum(r)) / (r.size ** 2)
    return term1 - term2


if __name__ == "__main__":
    key = jax.random.PRNGKey(0)
    k1, k2 = jax.random.split(key)
    # NCHW-like inputs (the loss is layout-agnostic; flattened inside).
    x_shape = (2, 4, 16, 16)
    log_pred = jax.random.normal(k1, x_shape, dtype=jnp.float32)
    log_gt = jax.random.normal(k2, x_shape, dtype=jnp.float32)

    loss = scale_invariant_log_loss(log_pred, log_gt)
    loss = jax.block_until_ready(loss)

    ref = _reference(log_pred, log_gt)
    assert jnp.allclose(loss, ref, atol=1e-5, rtol=1e-5), (loss, ref)
    print("KERNEL_OK")
</pallas_src>

<mosaic_0001>
module attributes {stable_mosaic.version = 11 : i64} {
  func.func @_silog_kernel(%arg0: i32, %arg1: i32, %arg2: memref<16x128xf32, #tpu.memory_space<vmem>>, %arg3: memref<16x128xf32, #tpu.memory_space<vmem>>, %arg4: memref<1x1xf32, #tpu.memory_space<smem>>, %arg5: memref<1x1xf32, #tpu.memory_space<smem>>, %arg6: memref<16x128xf32, #tpu.memory_space<vmem>>, %arg7: memref<16x128xf32, #tpu.memory_space<vmem>>) attributes {dimension_semantics = [#tpu.dimension_semantics<parallel>, #tpu.dimension_semantics<arbitrary>], iteration_bounds = array<i64: 1, 1>, scalar_prefetch = 0 : i64, scratch_operands = 2 : i64, tpu.core_type = #tpu.core_type<tc>, window_params = [{transform_indices = @transform_0, window_bounds = array<i64: 16, 128>}, {transform_indices = @transform_1, window_bounds = array<i64: 16, 128>}, {transform_indices = @transform_2, window_bounds = array<i64: 1, 1>}, {transform_indices = @transform_3, window_bounds = array<i64: 1, 1>}]} {
    %c0_i32 = arith.constant 0 : i32
    %0 = arith.cmpi eq, %arg1, %c0_i32 : i32
    %1 = arith.extui %0 : i1 to i32
    %c0_i32_0 = arith.constant 0 : i32
    %2 = arith.cmpi ne, %1, %c0_i32_0 : i32
    scf.if %2 {
      %cst = arith.constant 0.000000e+00 : f32
      %16 = vector.broadcast %cst : f32 to vector<16x128xf32>
      %c0_14 = arith.constant 0 : index
      %c0_15 = arith.constant 0 : index
      %17 = vector.load %arg6[%c0_14, %c0_15] : memref<16x128xf32, #tpu.memory_space<vmem>>, vector<16x128xf32>
      tpu.vector_store %arg6[%c0_14, %c0_15], %16 {strides = array<i32>} : memref<16x128xf32, #tpu.memory_space<vmem>>, vector<16x128xf32>,
      %cst_16 = arith.constant 0.000000e+00 : f32
      %18 = vector.broadcast %cst_16 : f32 to vector<16x128xf32>
      %c0_17 = arith.constant 0 : index
      %c0_18 = arith.constant 0 : index
      %19 = vector.load %arg7[%c0_17, %c0_18] : memref<16x128xf32, #tpu.memory_space<vmem>>, vector<16x128xf32>
      tpu.vector_store %arg7[%c0_17, %c0_18], %18 {strides = array<i32>} : memref<16x128xf32, #tpu.memory_space<vmem>>, vector<16x128xf32>,
    } else {
    }
    %c0 = arith.constant 0 : index
    %c0_1 = arith.constant 0 : index
    %3 = vector.load %arg2[%c0, %c0_1] : memref<16x128xf32, #tpu.memory_space<vmem>>, vector<16x128xf32>
    %c0_2 = arith.constant 0 : index
    %c0_3 = arith.constant 0 : index
    %4 = vector.load %arg3[%c0_2, %c0_3] : memref<16x128xf32, #tpu.memory_space<vmem>>, vector<16x128xf32>
    %5 = arith.subf %3, %4 : vector<16x128xf32>
    %c0_4 = arith.constant 0 : index
    %c0_5 = arith.constant 0 : index
    %6 = vector.load %arg6[%c0_4, %c0_5] : memref<16x128xf32, #tpu.memory_space<vmem>>, vector<16x128xf32>
    %7 = arith.addf %6, %5 : vector<16x128xf32>
    %c0_6 = arith.constant 0 : index
    %c0_7 = arith.constant 0 : index
    %8 = vector.load %arg6[%c0_6, %c0_7] : memref<16x128xf32, #tpu.memory_space<vmem>>, vector<16x128xf32>
    tpu.vector_store %arg6[%c0_6, %c0_7], %7 {strides = array<i32>} : memref<16x128xf32, #tpu.memory_space<vmem>>, vector<16x128xf32>,
    %c0_8 = arith.constant 0 : index
    %c0_9 = arith.constant 0 : index
    %9 = vector.load %arg7[%c0_8, %c0_9] : memref<16x128xf32, #tpu.memory_space<vmem>>, vector<16x128xf32>
    %10 = arith.mulf %5, %5 : vector<16x128xf32>
    %11 = arith.addf %9, %10 : vector<16x128xf32>
    %c0_10 = arith.constant 0 : index
    %c0_11 = arith.constant 0 : index
    %12 = vector.load %arg7[%c0_10, %c0_11] : memref<16x128xf32, #tpu.memory_space<vmem>>, vector<16x128xf32>
    tpu.vector_store %arg7[%c0_10, %c0_11], %11 {strides = array<i32>} : memref<16x128xf32, #tpu.memory_space<vmem>>, vector<16x128xf32>,
    %c0_i32_12 = arith.constant 0 : i32
    %13 = arith.cmpi eq, %arg1, %c0_i32_12 : i32
    %14 = arith.extui %13 : i1 to i32
    %c0_i32_13 = arith.constant 0 : i32
    %15 = arith.cmpi ne, %14, %c0_i32_13 : i32
    scf.if %15 {
      %c0_14 = arith.constant 0 : index
      %c0_15 = arith.constant 0 : index
      %16 = vector.load %arg6[%c0_14, %c0_15] : memref<16x128xf32, #tpu.memory_space<vmem>>, vector<16x128xf32>
      %17 = vector.shape_cast %16 : vector<16x128xf32> to vector<1x16x128xf32>
      %cst = arith.constant dense<0.000000e+00> : vector<1xf32>
      %18 = vector.multi_reduction <add>, %17, %cst [1, 2] : vector<1x16x128xf32> to vector<1xf32>
      %19 = vector.shape_cast %18 : vector<1xf32> to vector<1x1x1xf32>
      %20 = vector.extract %19[0, 0, 0] : f32 from vector<1x1x1xf32>
      %c0_16 = arith.constant 0 : index
      %c0_17 = arith.constant 0 : index
      %21 = memref.load %arg4[%c0_16, %c0_17] : memref<1x1xf32, #tpu.memory_space<smem>>
      memref.store %20, %arg4[%c0_16, %c0_17] : memref<1x1xf32, #tpu.memory_space<smem>>
      %c0_18 = arith.constant 0 : index
      %c0_19 = arith.constant 0 : index
      %22 = vector.load %arg7[%c0_18, %c0_19] : memref<16x128xf32, #tpu.memory_space<vmem>>, vector<16x128xf32>
      %23 = vector.shape_cast %22 : vector<16x128xf32> to vector<1x16x128xf32>
      %cst_20 = arith.constant dense<0.000000e+00> : vector<1xf32>
      %24 = vector.multi_reduction <add>, %23, %cst_20 [1, 2] : vector<1x16x128xf32> to vector<1xf32>
      %25 = vector.shape_cast %24 : vector<1xf32> to vector<1x1x1xf32>
      %26 = vector.extract %25[0, 0, 0] : f32 from vector<1x1x1xf32>
      %c0_21 = arith.constant 0 : index
      %c0_22 = arith.constant 0 : index
      %27 = memref.load %arg5[%c0_21, %c0_22] : memref<1x1xf32, #tpu.memory_space<smem>>
      memref.store %26, %arg5[%c0_21, %c0_22] : memref<1x1xf32, #tpu.memory_space<smem>>
    } else {
    }
    return
  }
  func.func @transform_0(%arg0: i32, %arg1: i32) -> (i32, i32) {
    %c1_i32 = arith.constant 1 : i32
    %0 = arith.muli %arg0, %c1_i32 : i32
    %1 = arith.addi %0, %arg1 : i32
    %c0_i32 = arith.constant 0 : i32
    %2 = arith.minsi %1, %c0_i32 : i32
    %c0_i32_0 = arith.constant 0 : i32
    %c0_i32_1 = arith.constant 0 : i32
    return %2, %c0_i32_0 : i32, i32
  }
  func.func @transform_1(%arg0: i32, %arg1: i32) -> (i32, i32) {
    %c1_i32 = arith.constant 1 : i32
    %0 = arith.muli %arg0, %c1_i32 : i32
    %1 = arith.addi %0, %arg1 : i32
    %c0_i32 = arith.constant 0 : i32
    %2 = arith.minsi %1, %c0_i32 : i32
    %c0_i32_0 = arith.constant 0 : i32
    %c0_i32_1 = arith.constant 0 : i32
    return %2, %c0_i32_0 : i32, i32
  }
  func.func @transform_2(%arg0: i32, %arg1: i32) -> (i32, i32) {
    %c0_i32 = arith.constant 0 : i32
    %c0_i32_0 = arith.constant 0 : i32
    return %arg0, %c0_i32 : i32, i32
  }
  func.func @transform_3(%arg0: i32, %arg1: i32) -> (i32, i32) {
    %c0_i32 = arith.constant 0 : i32
    %c0_i32_0 = arith.constant 0 : i32
    return %arg0, %c0_i32 : i32, i32
  }
}

</mosaic_0001>

<bundles_post_ra>
// kernel: tpu_custom_call.1
= control target key start
LH: loop header
LB: loop body
LE: loop exit
PB: predicated region body
PF: predicated region fallthrough
CT: control target
= control target key end

     0   :  { %9 = vsyncpa [#allocation5], 0  ;;  %s309_s0 = inlined_call_operand.hbm [shape: f32[16,128], index: 0, kind: input, shape index: {}]   ;;  %s310_s1 = inlined_call_operand.hbm [shape: f32[16,128], index: 1, kind: input, shape index: {}]   ;;  %s311_s2 = inlined_call_operand.hbm [shape: f32[1,1], index: 2, kind: output, shape index: {0}]   ;;  %s312_s3 = inlined_call_operand.hbm [shape: f32[1,1], index: 3, kind: output, shape index: {1}]  }
   0x1   :  { %10 = vsyncpa [#allocation8], 0 }
   0x2   :  { %11 = vsyncpa [#allocation6], 0 }
   0x3   :  { %12 = vsyncpa [#allocation11], 0  ;;  %s235_s12 = smov [#allocation4]   ;;  %s163_s16 = scalar_lea.hbm %s309_s0, 256 }
   0x4   :  { %s24_s13 = sshll.u32 %s235_s12, 4  ;;  %p164_p0 = scmp.ne.s32.totalorder %s309_s0, %s163_s16  ;;  %s25_s13 = int_to_ptr.vmem [resolvable:$true] %s24_s13 }
   0x5   :  { %p167_p1 = scmp.lt.u32.totalorder %s163_s16, %s309_s0 }
   0x7   :  { %p169_p2 = pnand %p167_p1, %p164_p0 }
   0x9   :  { %172 = shalt.err (!%p169_p2)
}
   0xa   :  { %s173_s21 = scalar_lea.vmem %s25_s13, 256  ;;  %p178_p4 = scmp.lt.s32.totalorder %s25_s13, %s25_s13 }
   0xb   :  { %p174_p3 = scmp.ne.s32.totalorder %s25_s13, %s173_s21  ;;  %p179_p5 = scmp.lt.s32.totalorder %s173_s21, %s173_s21 }
   0xd   :  { %p180_p6 = por %p179_p5, %p178_p4 }
   0xf   :  { %p181_p7 = pnand %p180_p6, %p174_p3 }
  0x11   :  { %184 = shalt.err (!%p181_p7)
}
  0x12   :  { %s236_s22 = smov 128   ;;  %s237_s23 = smov 8  }
  0x13   :  { %30 = dma.hbm_to_vmem [thread:$0]  %s309_s0, 256, %s25_s13, [#allocation5], %s236_s22, %s236_s22, %s237_s23  }
  0x14   :  { %s238_s26 = smov [#allocation7]   ;;  %s185_s30 = scalar_lea.hbm %s310_s1, 256 }
  0x15   :  { %s42_s27 = sshll.u32 %s238_s26, 4  ;;  %p186_p8 = scmp.ne.s32.totalorder %s310_s1, %s185_s30  ;;  %s43_s27 = int_to_ptr.vmem [resolvable:$true] %s42_s27 }
  0x16   :  { %p189_p9 = scmp.lt.u32.totalorder %s185_s30, %s310_s1 }
  0x18   :  { %p191_p10 = pnand %p189_p9, %p186_p8 }
  0x1a   :  { %194 = shalt.err (!%p191_p10)
}
  0x1b   :  { %s195_s8 = scalar_lea.vmem %s43_s27, 256  ;;  %p200_p12 = scmp.lt.s32.totalorder %s43_s27, %s43_s27 }
  0x1c   :  { %p196_p11 = scmp.ne.s32.totalorder %s43_s27, %s195_s8  ;;  %p201_p13 = scmp.lt.s32.totalorder %s195_s8, %s195_s8 }
  0x1e   :  { %p202_p0 = por %p201_p13, %p200_p12 }
  0x20   :  { %p203_p1 = pnand %p202_p0, %p196_p11 }
  0x22   :  { %206 = shalt.err (!%p203_p1)
}
  0x23   :  { %48 = dma.hbm_to_vmem [thread:$0]  %s310_s1, 256, %s43_s27, [#allocation8], %s236_s22, %s236_s22, %s237_s23  }
  0x24   :  { %227 = dma.done.wait [#allocation5], 256  }
  0x25   :  { %228 = vsyncadd [#allocation5], 4294967040 }
  0x26   :  { %229 = dma.done.wait [#allocation8], 256  }
  0x27   :  { %230 = vsyncadd [#allocation8], 4294967040  ;;  %v71_v0 = vld [vmem:[#allocation4] sm:$0xff]  ;;  %v72_v1 = vld [vmem:[#allocation4 + $0x8] sm:$0xff]  ;;  %s207_s12 = scalar_lea.hbm %s311_s2, 16 }
  0x28   :  { %v73_v2 = vld [vmem:[#allocation7] sm:$0xff]  ;;  %v74_v3 = vld [vmem:[#allocation7 + $0x8] sm:$0xff]  ;;  %p208_p2 = scmp.ne.s32.totalorder %s311_s2, %s207_s12  ;;  %p211_p3 = scmp.lt.u32.totalorder %s207_s12, %s311_s2 }
  0x29   :  { %v75_v4 = vsub.f32 %v71_v0, %v73_v2  ;;  %v76_v5 = vsub.f32 %v72_v1, %v74_v3 }
  0x2a   :  { %p213_p4 = pnand %p211_p3, %p208_p2 }
  0x2b   :  { %v85_v6 = vmul.f32 %v75_v4, %v75_v4  ;;  %v96_v7 = vadd.f32 %v76_v5, %v75_v4  ;;  %v86_v8 = vmul.f32 %v76_v5, %v76_v5 }
  0x2d   :  { %97 = vadd.xlane.f32.xlu0 %v96_v7  ;;  %v110_v9 = vadd.f32 %v86_v8, %v85_v6 }
  0x31   :  { %111 = vadd.xlane.f32.xlu0 %v110_v9 }
  0xba   :  { %v98_v10 = vpop.xlane.xlu0 %97 }
  0xbb   :  { %v99_v11 = vrot.slane %v98_v10, 4 }
  0xbd   :  { %v100_v12 = vadd.f32 %v99_v11, %v98_v10 }
  0xbe   :  { %v112_v13 = vpop.xlane.xlu0 %111 }
  0xbf   :  { %v101_v14 = vrot.slane %v100_v12, 2  ;;  %v113_v15 = vrot.slane %v112_v13, 4 }
  0xc1   :  { %v114_v16 = vadd.f32 %v113_v15, %v112_v13  ;;  %v102_v17 = vadd.f32 %v101_v14, %v100_v12 }
  0xc3   :  { %v115_v18 = vrot.slane %v114_v16, 2  ;;  %v103_v19 = vrot.slane %v102_v17, 1 }
  0xc5   :  { %v116_v20 = vadd.f32 %v115_v18, %v114_v16  ;;  %v104_v21 = vadd.f32 %v103_v19, %v102_v17 }
  0xc7   :  { %153 = vpush %v104_v21  ;;  %v117_v22 = vrot.slane %v116_v20, 1 }
  0xc9   :  { %v118_v23 = vadd.f32 %v117_v22, %v116_v20 }
  0xcb   :  { %155 = vpush %v118_v23 }
  0xf8   :  { %s154_s1 = spop %153 }
  0xf9   :  { %107 = sst [smem:[#allocation9]] %s154_s1 }
  0xfa   :  { %216 = shalt.err (!%p213_p4)
}
  0xfb   :  { %s239_s17 = smov [#allocation9]   ;;  %s217_s23 = scalar_lea.hbm %s312_s3, 16 }
  0xfc   :  { %129 = dma.smem_to_hbm %s239_s17, 16, %s311_s2, [#allocation6]  }
  0xfd   :  { %s156_s20 = spop %155  ;;  %p218_p5 = scmp.ne.s32.totalorder %s312_s3, %s217_s23 }
  0xfe   :  { %121 = sst [smem:[#allocation10]] %s156_s20  ;;  %p221_p6 = scmp.lt.u32.totalorder %s217_s23, %s312_s3 }
 0x100   :  { %p223_p7 = pnand %p221_p6, %p218_p5 }
 0x102   :  { %226 = shalt.err (!%p223_p7)
}
 0x103   :  { %s240_s28 = smov [#allocation10]  }
 0x104   :  { %137 = dma.smem_to_hbm %s240_s28, 16, %s312_s3, [#allocation11]  }
 0x105   :  { %231 = dma.done.wait [#allocation6], 16  }
 0x106   :  { %232 = vsyncadd [#allocation6], 4294967280 }
 0x107   :  { %233 = dma.done.wait [#allocation11], 16  }
 0x108   :  { %234 = vsyncadd [#allocation11], 4294967280 }
 0x109   :  { %144 = sfence }
 0x10a   :  { %145 = vsyncpa [#allocation5], 1 }
 0x10b   :  { %146 = vsyncpa [#allocation8], 1 }
 0x10c   :  { %147 = vsyncpa [#allocation6], 1 }
 0x10d   :  { %148 = vsyncpa [#allocation11], 1 }

</bundles_post_ra>
